<compile_context>
chip_gen: v6e
topology: v6e:2x2x1
jax: 0.10.0
libtpu: 0.0.40
codegen_flags: <defaults>
</compile_context>

<pallas_src>
import jax
import jax.numpy as jnp
from jax.experimental import pallas as pl
from jax.experimental.pallas import tpu as pltpu


def _add_pos_kernel(x_ref, pos_ref, o_ref):
    # x_ref: (tb, tn), pos_ref: (1, tn) broadcast over rows, o_ref: (tb, tn)
    o_ref[...] = x_ref[...] + pos_ref[...]


def _largest_tile(total, cap, quantum):
    """Largest t <= cap with t % quantum == 0 and total % t == 0.

    Falls back to `total` (full-dim block, always layout-legal) if no such
    divisor exists or if `total` already fits under the cap.
    """
    if total <= cap:
        return total
    t = (cap // quantum) * quantum
    while t >= quantum:
        if total % t == 0:
            return t
        t -= quantum
    return total


def learned_positional_encoding(x, position_embeddings):
    """x: (B, S, C), position_embeddings: (1, S, C) -> (B, S, C)."""
    B, S, C = x.shape
    assert position_embeddings.shape == (1, S, C)
    assert position_embeddings.dtype == x.dtype

    N = S * C
    itemsize = jnp.dtype(x.dtype).itemsize

    # Flatten trailing dims -> lane-dense 2-D layout (last dim multiple of 128
    # whenever possible; otherwise the full row, which is also layout-legal).
    x2 = x.reshape(B, N)
    pos2 = position_embeddings.reshape(1, N)

    # Column tile: lane-dense, capped so one buffer stays within budget.
    COL_CAP = 16384                       # multiple of 128
    tn = _largest_tile(N, COL_CAP, 128)

    # Row tile: keep each x/out buffer <= ~4 MiB so the double-buffered
    # working set (x, out, pos) stays well under v7x's 64 MiB VMEM.
    MAX_TILE_BYTES = 4 * 1024 * 1024
    row_cap = max(8, MAX_TILE_BYTES // max(1, tn * itemsize))
    tb = _largest_tile(B, row_cap, 8)

    # Grid: columns OUTER, batch INNER -> the pos block index (0, j) is
    # constant across the inner batch loop, so the pos tile stays resident
    # and is DMA'd only (N // tn) times.
    grid = (N // tn, B // tb)

    out2 = pl.pallas_call(
        _add_pos_kernel,
        out_shape=jax.ShapeDtypeStruct((B, N), x.dtype),
        grid_spec=pltpu.PrefetchScalarGridSpec(
            num_scalar_prefetch=0,
            grid=grid,
            in_specs=[
                pl.BlockSpec((tb, tn), lambda j, b: (b, j)),   # x tile
                pl.BlockSpec((1, tn), lambda j, b: (0, j)),    # pos tile (shared over batch)
            ],
            out_specs=pl.BlockSpec((tb, tn), lambda j, b: (b, j)),
        ),
        compiler_params=pltpu.CompilerParams(
            dimension_semantics=("parallel", "parallel"),
            vmem_limit_bytes=48 * 1024 * 1024,   # headroom under v7x's 64 MiB
        ),
        # In-place add into x's buffer (shapes/dtypes match); XLA copies the
        # operand automatically if the caller still needs x.
        input_output_aliases={0: 0},
    )(x2, pos2)

    return out2.reshape(B, S, C)


if __name__ == "__main__":
    # Shapes implied by the forward: x is (B, H_W_L, C).
    B, S, C = 2, 8, 32

    key = jax.random.PRNGKey(0)
    x = jax.random.normal(key, (B, S, C), dtype=jnp.float32)

    # The reference forward re-creates the positional embeddings as
    # zeros(1, H_W_L, C) every call, so we do the same (deterministic).
    position_embeddings = jnp.zeros((1, S, C), dtype=jnp.float32)

    out = learned_positional_encoding(x, position_embeddings)
    out = jax.block_until_ready(out)

    # Correctness check against the pure-JAX reference: x + pos (broadcast).
    ref = x + position_embeddings
    assert out.shape == (B, S, C)
    assert out.dtype == x.dtype
    assert jnp.allclose(out, ref), "mismatch vs reference"

    print("KERNEL_OK")
</pallas_src>

<mosaic_0001>
module attributes {stable_mosaic.version = 11 : i64} {
  func.func @_add_pos_kernel(%arg0: i32, %arg1: i32, %arg2: memref<2x256xf32, #tpu.memory_space<vmem>>, %arg3: memref<1x256xf32, #tpu.memory_space<vmem>>, %arg4: memref<2x256xf32, #tpu.memory_space<vmem>>) attributes {dimension_semantics = [#tpu.dimension_semantics<parallel>, #tpu.dimension_semantics<parallel>], iteration_bounds = array<i64: 1, 1>, scalar_prefetch = 0 : i64, scratch_operands = 0 : i64, tpu.core_type = #tpu.core_type<tc>, window_params = [{transform_indices = @transform_0, window_bounds = array<i64: 2, 256>}, {transform_indices = @transform_1, window_bounds = array<i64: 1, 256>}, {transform_indices = @transform_2, window_bounds = array<i64: 2, 256>}]} {
    %c0 = arith.constant 0 : index
    %c0_0 = arith.constant 0 : index
    %0 = vector.load %arg2[%c0, %c0_0] : memref<2x256xf32, #tpu.memory_space<vmem>>, vector<2x256xf32>
    %c0_1 = arith.constant 0 : index
    %c0_2 = arith.constant 0 : index
    %1 = vector.load %arg3[%c0_1, %c0_2] : memref<1x256xf32, #tpu.memory_space<vmem>>, vector<1x256xf32>
    %2 = vector.broadcast %1 : vector<1x256xf32> to vector<2x256xf32>
    %3 = arith.addf %0, %2 : vector<2x256xf32>
    %c0_3 = arith.constant 0 : index
    %c0_4 = arith.constant 0 : index
    %4 = vector.load %arg4[%c0_3, %c0_4] : memref<2x256xf32, #tpu.memory_space<vmem>>, vector<2x256xf32>
    tpu.vector_store %arg4[%c0_3, %c0_4], %3 {strides = array<i32>} : memref<2x256xf32, #tpu.memory_space<vmem>>, vector<2x256xf32>,
    return
  }
  func.func @transform_0(%arg0: i32, %arg1: i32) -> (i32, i32) {
    %c0_i32 = arith.constant 0 : i32
    return %arg1, %arg0 : i32, i32
  }
  func.func @transform_1(%arg0: i32, %arg1: i32) -> (i32, i32) {
    %c0_i32 = arith.constant 0 : i32
    %c0_i32_0 = arith.constant 0 : i32
    return %c0_i32, %arg0 : i32, i32
  }
  func.func @transform_2(%arg0: i32, %arg1: i32) -> (i32, i32) {
    %c0_i32 = arith.constant 0 : i32
    return %arg1, %arg0 : i32, i32
  }
}

</mosaic_0001>

<bundles_post_ra>
// kernel: tpu_custom_call.1
= control target key start
LH: loop header
LB: loop body
LE: loop exit
PB: predicated region body
PF: predicated region fallthrough
CT: control target
= control target key end

     0   :  { %7 = vsyncpa [#allocation3], 0  ;;  %s135_s0 = inlined_call_operand.hbm [shape: f32[2,256], index: 0, kind: input, shape index: {}, may-alias: {0,2}]   ;;  %s136_s1 = inlined_call_operand.vmem [shape: f32[1,256], index: 1, kind: input, shape index: {}]   ;;  %s137_s2 = inlined_call_operand.hbm [shape: f32[2,256], index: 2, kind: output, shape index: {}, may-alias: {0,2}]  }
   0x1   :  { %8 = vsyncpa [#allocation4], 0  ;;  %s108_s9 = smov [#allocation2]  }
   0x2   :  { %s15_s10 = sshll.u32 %s108_s9, 4  ;;  %s16_s10 = int_to_ptr.vmem [resolvable:$true] %s15_s10 }
   0x3   :  { %s72_s11 = scalar_lea.vmem %s16_s10, 64  ;;  %p77_p1 = scmp.lt.s32.totalorder %s16_s10, %s16_s10 }
   0x4   :  { %p73_p0 = scmp.ne.s32.totalorder %s16_s10, %s72_s11  ;;  %p78_p2 = scmp.lt.s32.totalorder %s72_s11, %s72_s11 }
   0x6   :  { %p79_p3 = por %p78_p2, %p77_p1 }
   0x8   :  { %p80_p4 = pnand %p79_p3, %p73_p0 }
   0xa   :  { %83 = shalt.err (!%p80_p4)
}
   0xb   :  { %18 = dma.hbm_to_vmem [thread:$0]  %s135_s0, 64, %s16_s10, [#allocation3]  }
   0xc   :  { %104 = dma.done.wait [#allocation3], 64  }
   0xd   :  { %105 = vsyncadd [#allocation3], 4294967232  ;;  %v27_v0 = vlaneseq  ;;  %v109_v1 = vmov 1983009808   ;;  %v25_v7 = vld [vmem:[%s136_s1] sm:$0x3] }
   0xe   :  { %v37_v2 = vunpack.c.l.s4 %v109_v1  ;;  %v24_v12 = vld [vmem:[#allocation2] sm:$0xf]  ;;  %s110_s16 = smov [#allocation5]  }
   0xf   :  { %v28_v3 = vshrl.u32 %v27_v0, 7  ;;  %s52_s0 = sshll.u32 %s110_s16, 4  ;;  %s53_s0 = int_to_ptr.vmem [resolvable:$true] %s52_s0 }
  0x10   :  { %v38_v6 = vunpack.c.0.s8 %v37_v2  ;;  %s84_s17 = scalar_lea.vmem %s53_s0, 64  ;;  %p89_p6 = scmp.lt.s32.totalorder %s53_s0, %s53_s0 }
  0x11   :  { %v29_v4 = vsub.s32 0, %v28_v3  ;;  %v33_v5 = vsub.s32 1, %v28_v3  ;;  %p85_p5 = scmp.ne.s32.totalorder %s53_s0, %s84_s17  ;;  %p90_p7 = scmp.lt.s32.totalorder %s84_s17, %s84_s17 }
  0x12   :  { %v41_v10 = vsub.s32 %v38_v6, %v28_v3 }
  0x13   :  { %v30_v8 = vrot.slane %v25_v7, %v29_v4  ;;  %v34_v9 = vrot.slane %v25_v7, %v33_v5  ;;  %p91_p8 = por %p90_p7, %p89_p6 }
  0x15   :  { %v35_v11 = vcombine.low %v30_v8, %v34_v9  ;;  %p92_p9 = pnand %p91_p8, %p85_p5 }
  0x17   :  { %v42_v13 = vrot.slane %v35_v11, %v41_v10 }
  0x19   :  { %v44_v14 = vadd.f32 %v42_v13, %v24_v12 }
  0x1b   :  { %45 = vst [vmem:[#allocation5] sm:$0xf] %v44_v14 }
  0x1c   :  { %95 = shalt.err (!%p92_p9)
}
  0x1d   :  { %55 = dma.vmem_to_hbm [thread:$0]  %s53_s0, 64, %s137_s2, [#allocation4]  }
  0x1e   :  { %106 = dma.done.wait [#allocation4], 64  }
  0x1f   :  { %107 = vsyncadd [#allocation4], 4294967232 }
  0x20   :  { %59 = vsyncpa [#allocation3], 1 }
  0x21   :  { %60 = vsyncpa [#allocation4], 1 }

</bundles_post_ra>
